<compile_context>
chip_gen: v5e
topology: v5e:2x2
jax: 0.10.0
libtpu: 0.0.40
codegen_flags: <defaults>
</compile_context>

<pallas_src>
import functools

import jax
import jax.numpy as jnp
from jax import lax
from jax.experimental import pallas as pl
from jax.experimental.pallas import tpu as pltpu


def _round_up(x, m):
    return (x + m - 1) // m * m


# ----------------------------- Pallas kernel ------------------------------- #
def _gemm_bn_relu_kernel(p_ref, w_ref, shift_ref, o_ref):
    """One (tm, tn) output tile of relu(patches @ w_scaled + shift).

    p_ref:     (tm, tk)  bf16 im2col patches tile
    w_ref:     (tk, tn)  bf16 conv weights tile (BN scale folded in)
    shift_ref: (1,  tn)  f32 per-channel shift (conv bias + BN shift folded)
    o_ref:     (tm, tn)  f32 output tile; doubles as the f32 accumulator
                         (resident across the trailing K grid axis).
    """
    k = pl.program_id(2)

    @pl.when(k == 0)
    def _init():
        o_ref[...] = jnp.zeros_like(o_ref)

    o_ref[...] += jnp.dot(p_ref[...], w_ref[...],
                          preferred_element_type=jnp.float32)

    @pl.when(k == pl.num_programs(2) - 1)
    def _finalize():
        o_ref[...] = jnp.maximum(o_ref[...] + shift_ref[...], 0.0)


def _conv_bn_relu_gemm(patches, w_mat, shift, *, tm, tn, tk):
    """patches (Mp, Kp) bf16 @ w_mat (Kp, Np) bf16 + shift (1, Np) f32 -> relu."""
    mp, kp = patches.shape
    _, np_ = w_mat.shape
    grid = (mp // tm, np_ // tn, kp // tk)
    return pl.pallas_call(
        _gemm_bn_relu_kernel,
        out_shape=jax.ShapeDtypeStruct((mp, np_), jnp.float32),
        grid_spec=pltpu.PrefetchScalarGridSpec(
            num_scalar_prefetch=0,
            grid=grid,
            in_specs=[
                pl.BlockSpec((tm, tk), lambda i, j, k: (i, k)),
                pl.BlockSpec((tk, tn), lambda i, j, k: (k, j)),
                pl.BlockSpec((1, tn), lambda i, j, k: (0, j)),
            ],
            out_specs=pl.BlockSpec((tm, tn), lambda i, j, k: (i, j)),
        ),
        compiler_params=pltpu.CompilerParams(
            dimension_semantics=("parallel", "parallel", "arbitrary")),
    )(patches, w_mat, shift)


# ------------------------------ JAX glue ----------------------------------- #
def _im2col_nhwc(x, kh, kw, stride, padding):
    """x: (N, C, H, W) -> patches (N*OH*OW, KH*KW*C).

    K order is (kh, kw, cin) with cin fastest (channel/lane-major concat,
    avoids a large 5-D transpose of the patch tensor)."""
    n, c, h, w = x.shape
    xh = jnp.transpose(x, (0, 2, 3, 1))                      # NHWC
    xp = jnp.pad(xh, ((0, 0), (padding, padding), (padding, padding), (0, 0)))
    oh = (h + 2 * padding - kh) // stride + 1
    ow = (w + 2 * padding - kw) // stride + 1
    cols = []
    for i in range(kh):
        for j in range(kw):
            cols.append(xp[:, i:i + (oh - 1) * stride + 1:stride,
                              j:j + (ow - 1) * stride + 1:stride, :])  # (N,OH,OW,C)
    p = jnp.concatenate(cols, axis=-1)                       # (N, OH, OW, KH*KW*C)
    return p.reshape(n * oh * ow, kh * kw * c), oh, ow


def conv2d_block(x, params, kernel_size, stride, padding, eps=1e-5):
    """Forward of the SyncNet Conv2D block.  x: NCHW float32 -> NCHW float32."""
    w = params["conv_w"]          # (Cout, Cin, KH, KW) -- PyTorch layout
    b = params["conv_b"]          # (Cout,)
    gamma = params["bn_gamma"]    # (Cout,)
    beta = params["bn_beta"]      # (Cout,)
    rmean = params["bn_mean"]     # (Cout,)
    rvar = params["bn_var"]       # (Cout,)

    cout, cin, kh, kw = w.shape
    n = x.shape[0]

    # Fold eval-mode BN: scale goes into the GEMM weights, shift into epilogue.
    scale = gamma / jnp.sqrt(rvar + eps)                     # (Cout,)
    shift = (b - rmean) * scale + beta                       # (Cout,)

    patches, oh, ow = _im2col_nhwc(x, kh, kw, stride, padding)   # (M, K) f32
    M, K = patches.shape
    # Re-flatten OIHW weights to the patches' (kh, kw, cin) K order.
    w_mat = jnp.transpose(w, (2, 3, 1, 0)).reshape(K, cout) * scale[None, :]

    # Tile sizes: 8/128-aligned, lane-dense output (Cout padded to >=128),
    # capped so double-buffered bf16 tiles + resident f32 output tile stay
    # well inside the scoped-VMEM default on every generation (~4.5 MiB max).
    tm = min(1024, _round_up(M, 8))
    tn = min(256, _round_up(cout, 128))
    tk = min(512, _round_up(K, 128))
    mp = _round_up(M, tm)
    np_ = _round_up(cout, tn)
    kp = _round_up(K, tk)

    # Zero-pad (zeros in padded weight columns / shift -> ReLU(0) = 0), cast
    # MXU operands to bf16 (f32 accumulation inside the kernel).
    p_pad = jnp.pad(patches, ((0, mp - M), (0, kp - K))).astype(jnp.bfloat16)
    w_pad = jnp.pad(w_mat, ((0, kp - K), (0, np_ - cout))).astype(jnp.bfloat16)
    s_pad = jnp.pad(shift, (0, np_ - cout)).reshape(1, np_).astype(jnp.float32)

    out = _conv_bn_relu_gemm(p_pad, w_pad, s_pad, tm=tm, tn=tn, tk=tk)
    out = out[:M, :cout].reshape(n, oh, ow, cout)
    return jnp.transpose(out, (0, 3, 1, 2))                  # NCHW


def init_params(key, cin, cout, kernel_size):
    ks = jax.random.split(key, 6)
    fan_in = cin * kernel_size * kernel_size
    bound = 1.0 / jnp.sqrt(fan_in)
    return {
        "conv_w": jax.random.uniform(
            ks[0], (cout, cin, kernel_size, kernel_size),
            minval=-bound, maxval=bound, dtype=jnp.float32),
        "conv_b": jax.random.uniform(
            ks[1], (cout,), minval=-bound, maxval=bound, dtype=jnp.float32),
        "bn_gamma": 1.0 + 0.1 * jax.random.normal(ks[2], (cout,), jnp.float32),
        "bn_beta": 0.1 * jax.random.normal(ks[3], (cout,), jnp.float32),
        "bn_mean": 0.1 * jax.random.normal(ks[4], (cout,), jnp.float32),
        "bn_var": jnp.abs(1.0 + 0.1 * jax.random.normal(ks[5], (cout,), jnp.float32)),
    }


def _reference(x, params, kernel_size, stride, padding, eps=1e-5):
    """Pure-JAX f32 reference (lax conv) for correctness checking."""
    w = params["conv_w"]
    out = lax.conv_general_dilated(
        x, w, window_strides=(stride, stride),
        padding=((padding, padding), (padding, padding)),
        dimension_numbers=("NCHW", "OIHW", "NCHW"))
    out = out + params["conv_b"][None, :, None, None]
    scale = params["bn_gamma"] / jnp.sqrt(params["bn_var"] + eps)
    out = (out - params["bn_mean"][None, :, None, None]) * scale[None, :, None, None] \
          + params["bn_beta"][None, :, None, None]
    return jnp.maximum(out, 0.0)


if __name__ == "__main__":
    key = jax.random.PRNGKey(0)
    k_x, k_p = jax.random.split(key)

    # Small shapes consistent with the module: batch=2, cin=4, 16x16 spatial.
    cin, cout, kernel_size, stride, padding = 4, 8, 3, 1, 1
    x = jax.random.normal(k_x, (2, cin, 16, 16), dtype=jnp.float32)
    params = init_params(k_p, cin, cout, kernel_size)

    fwd = jax.jit(functools.partial(
        conv2d_block, kernel_size=kernel_size, stride=stride, padding=padding))
    out = fwd(x, params)
    jax.block_until_ready(out)

    ref = _reference(x, params, kernel_size, stride, padding)
    assert out.shape == ref.shape, (out.shape, ref.shape)
    # bf16 MXU operands (f32 accumulation) -> relaxed tolerance vs f32 reference.
    assert jnp.allclose(out, ref, atol=2e-2, rtol=2e-2), "mismatch vs reference"

    print("KERNEL_OK")
</pallas_src>

<mosaic_0001>
module attributes {stable_mosaic.version = 11 : i64} {
  func.func @_gemm_bn_relu_kernel(%arg0: i32, %arg1: i32, %arg2: i32, %arg3: memref<512x128xbf16, #tpu.memory_space<vmem>>, %arg4: memref<128x128xbf16, #tpu.memory_space<vmem>>, %arg5: memref<1x128xf32, #tpu.memory_space<vmem>>, %arg6: memref<512x128xf32, #tpu.memory_space<vmem>>) attributes {dimension_semantics = [#tpu.dimension_semantics<parallel>, #tpu.dimension_semantics<parallel>, #tpu.dimension_semantics<arbitrary>], iteration_bounds = array<i64: 1, 1, 1>, scalar_prefetch = 0 : i64, scratch_operands = 0 : i64, tpu.core_type = #tpu.core_type<tc>, window_params = [{transform_indices = @transform_0, window_bounds = array<i64: 512, 128>}, {transform_indices = @transform_1, window_bounds = array<i64: 128, 128>}, {transform_indices = @transform_2, window_bounds = array<i64: 1, 128>}, {transform_indices = @transform_3, window_bounds = array<i64: 512, 128>}]} {
    %c0_i32 = arith.constant 0 : i32
    %0 = arith.cmpi eq, %arg2, %c0_i32 : i32
    %1 = arith.extui %0 : i1 to i32
    %c0_i32_0 = arith.constant 0 : i32
    %2 = arith.cmpi ne, %1, %c0_i32_0 : i32
    scf.if %2 {
      %cst_10 = arith.constant 0.000000e+00 : f32
      %12 = vector.broadcast %cst_10 : f32 to vector<512x128xf32>
      %c0_11 = arith.constant 0 : index
      %c0_12 = arith.constant 0 : index
      %13 = vector.load %arg6[%c0_11, %c0_12] : memref<512x128xf32, #tpu.memory_space<vmem>>, vector<512x128xf32>
      tpu.vector_store %arg6[%c0_11, %c0_12], %12 {strides = array<i32>} : memref<512x128xf32, #tpu.memory_space<vmem>>, vector<512x128xf32>,
    } else {
    }
    %c0 = arith.constant 0 : index
    %c0_1 = arith.constant 0 : index
    %3 = vector.load %arg6[%c0, %c0_1] : memref<512x128xf32, #tpu.memory_space<vmem>>, vector<512x128xf32>
    %c0_2 = arith.constant 0 : index
    %c0_3 = arith.constant 0 : index
    %4 = vector.load %arg3[%c0_2, %c0_3] : memref<512x128xbf16, #tpu.memory_space<vmem>>, vector<512x128xbf16>
    %c0_4 = arith.constant 0 : index
    %c0_5 = arith.constant 0 : index
    %5 = vector.load %arg4[%c0_4, %c0_5] : memref<128x128xbf16, #tpu.memory_space<vmem>>, vector<128x128xbf16>
    %cst = arith.constant dense<0.000000e+00> : vector<512x128xf32>
    %6 = tpu.matmul %4, %5, %cst {dimension_numbers = #tpu.dot_dimension_numbers<[1], [0], [0], [1], [0, 0, 1, 1], [], []>} : vector<512x128xbf16>, vector<128x128xbf16>, vector<512x128xf32> -> vector<512x128xf32>
    %7 = arith.addf %3, %6 : vector<512x128xf32>
    %c0_6 = arith.constant 0 : index
    %c0_7 = arith.constant 0 : index
    %8 = vector.load %arg6[%c0_6, %c0_7] : memref<512x128xf32, #tpu.memory_space<vmem>>, vector<512x128xf32>
    tpu.vector_store %arg6[%c0_6, %c0_7], %7 {strides = array<i32>} : memref<512x128xf32, #tpu.memory_space<vmem>>, vector<512x128xf32>,
    %c0_i32_8 = arith.constant 0 : i32
    %9 = arith.cmpi eq, %arg2, %c0_i32_8 : i32
    %10 = arith.extui %9 : i1 to i32
    %c0_i32_9 = arith.constant 0 : i32
    %11 = arith.cmpi ne, %10, %c0_i32_9 : i32
    scf.if %11 {
      %c0_10 = arith.constant 0 : index
      %c0_11 = arith.constant 0 : index
      %12 = vector.load %arg6[%c0_10, %c0_11] : memref<512x128xf32, #tpu.memory_space<vmem>>, vector<512x128xf32>
      %c0_12 = arith.constant 0 : index
      %c0_13 = arith.constant 0 : index
      %13 = vector.load %arg5[%c0_12, %c0_13] : memref<1x128xf32, #tpu.memory_space<vmem>>, vector<1x128xf32>
      %14 = vector.broadcast %13 : vector<1x128xf32> to vector<512x128xf32>
      %15 = arith.addf %12, %14 : vector<512x128xf32>
      %cst_14 = arith.constant 0.000000e+00 : f32
      %16 = vector.broadcast %cst_14 : f32 to vector<512x128xf32>
      %17 = arith.maximumf %15, %16 : vector<512x128xf32>
      %c0_15 = arith.constant 0 : index
      %c0_16 = arith.constant 0 : index
      %18 = vector.load %arg6[%c0_15, %c0_16] : memref<512x128xf32, #tpu.memory_space<vmem>>, vector<512x128xf32>
      tpu.vector_store %arg6[%c0_15, %c0_16], %17 {strides = array<i32>} : memref<512x128xf32, #tpu.memory_space<vmem>>, vector<512x128xf32>,
    } else {
    }
    return
  }
  func.func @transform_0(%arg0: i32, %arg1: i32, %arg2: i32) -> (i32, i32) {
    %c0_i32 = arith.constant 0 : i32
    return %arg0, %arg2 : i32, i32
  }
  func.func @transform_1(%arg0: i32, %arg1: i32, %arg2: i32) -> (i32, i32) {
    %c0_i32 = arith.constant 0 : i32
    return %arg2, %arg1 : i32, i32
  }
  func.func @transform_2(%arg0: i32, %arg1: i32, %arg2: i32) -> (i32, i32) {
    %c0_i32 = arith.constant 0 : i32
    %c0_i32_0 = arith.constant 0 : i32
    return %c0_i32, %arg1 : i32, i32
  }
  func.func @transform_3(%arg0: i32, %arg1: i32, %arg2: i32) -> (i32, i32) {
    %c0_i32 = arith.constant 0 : i32
    return %arg0, %arg1 : i32, i32
  }
}

</mosaic_0001>

<bundles_post_ra>
// kernel: conv2d_block.1
= control target key start
LH: loop header
LB: loop body
LE: loop exit
PB: predicated region body
PF: predicated region fallthrough
CT: control target
= control target key end

     0   :  { %s1657_s1 = inlined_call_operand.vmem [shape: bf16[128,128], index: 1, kind: input, shape index: {}]   ;;  %s1658_s2 = inlined_call_operand.vmem [shape: f32[1,128], index: 2, kind: input, shape index: {}]   ;;  %s1659_s0 = inlined_call_operand.vmem [shape: bf16[512,128], index: 0, kind: input, shape index: {}]   ;;  %s1660_s3 = inlined_call_operand.vmem [shape: f32[512,128], index: 3, kind: output, shape index: {}]  }
   0x1   :  { %v1229_v0 = vld [vmem:[%s1657_s1 + $0x38] sm:$0xff]  ;;  %v1228_v1 = vld [vmem:[%s1657_s1 + $0x30] sm:$0xff]  ;;  %v1227_v2 = vld [vmem:[%s1657_s1 + $0x28] sm:$0xff] }
   0x2   :  { %466 = vmatpush.bf16.msra.mxu0 %v1229_v0  ;;  %1230 = vmatpush.bf16.msra.mxu1 %v1229_v0  ;;  %v1226_v3 = vld [vmem:[%s1657_s1 + $0x20] sm:$0xff]  ;;  %v1225_v4 = vld [vmem:[%s1657_s1 + $0x18] sm:$0xff]  ;;  %v1224_v5 = vld [vmem:[%s1657_s1 + $0x10] sm:$0xff] }
   0x3   :  { %1231 = vmatpush.bf16.msra.mxu2 %v1229_v0  ;;  %1232 = vmatpush.bf16.msra.mxu3 %v1229_v0  ;;  %v1223_v6 = vld [vmem:[%s1657_s1 + $0x8] sm:$0xff]  ;;  %v1222_v7 = vld [vmem:[%s1657_s1] sm:$0xff]  ;;  %v1192_v16 = vld [vmem:[%s1659_s0 + $0x10] sm:$0xff] }
   0x4   :  { %v1190_v8 = vld [vmem:[%s1659_s0] sm:$0xff]  ;;  %v1191_v12 = vld [vmem:[%s1659_s0 + $0x8] sm:$0xff]  ;;  %v1200_v17 = vld [vmem:[%s1659_s0 + $0x50] sm:$0xff] }
   0x5   :  { %v1198_v9 = vld [vmem:[%s1659_s0 + $0x40] sm:$0xff]  ;;  %v1199_v13 = vld [vmem:[%s1659_s0 + $0x48] sm:$0xff]  ;;  %v1208_v18 = vld [vmem:[%s1659_s0 + $0x90] sm:$0xff] }
   0x6   :  { %467 = vmatpush.bf16.msra.mxu0 %v1228_v1  ;;  %1233 = vmatpush.bf16.msra.mxu1 %v1228_v1  ;;  %v1206_v10 = vld [vmem:[%s1659_s0 + $0x80] sm:$0xff]  ;;  %v1207_v14 = vld [vmem:[%s1659_s0 + $0x88] sm:$0xff]  ;;  %v1216_v19 = vld [vmem:[%s1659_s0 + $0xd0] sm:$0xff] }
   0x7   :  { %1234 = vmatpush.bf16.msra.mxu2 %v1228_v1  ;;  %1235 = vmatpush.bf16.msra.mxu3 %v1228_v1  ;;  %v1214_v11 = vld [vmem:[%s1659_s0 + $0xc0] sm:$0xff]  ;;  %v1215_v15 = vld [vmem:[%s1659_s0 + $0xc8] sm:$0xff]  ;;  %v1193_v20 = vld [vmem:[%s1659_s0 + $0x18] sm:$0xff] }
   0x8   :  { %v1201_v21 = vld [vmem:[%s1659_s0 + $0x58] sm:$0xff]  ;;  %v1194_v24 = vld [vmem:[%s1659_s0 + $0x20] sm:$0xff]  ;;  %v1195_v28 = vld [vmem:[%s1659_s0 + $0x28] sm:$0xff] }
   0x9   :  { %v1209_v22 = vld [vmem:[%s1659_s0 + $0x98] sm:$0xff]  ;;  %v1202_v25 = vld [vmem:[%s1659_s0 + $0x60] sm:$0xff]  ;;  %v1203_v29 = vld [vmem:[%s1659_s0 + $0x68] sm:$0xff] }
   0xa   :  { %468 = vmatpush.bf16.msra.mxu0 %v1227_v2  ;;  %1236 = vmatpush.bf16.msra.mxu1 %v1227_v2  ;;  %v1217_v23 = vld [vmem:[%s1659_s0 + $0xd8] sm:$0xff]  ;;  %v1210_v26 = vld [vmem:[%s1659_s0 + $0xa0] sm:$0xff]  ;;  %v1211_v30 = vld [vmem:[%s1659_s0 + $0xa8] sm:$0xff] }
   0xb   :  { %1237 = vmatpush.bf16.msra.mxu2 %v1227_v2  ;;  %1238 = vmatpush.bf16.msra.mxu3 %v1227_v2  ;;  %v1218_v27 = vld [vmem:[%s1659_s0 + $0xe0] sm:$0xff]  ;;  %v1219_v31 = vld [vmem:[%s1659_s0 + $0xe8] sm:$0xff]  ;;  %v1196_v32 = vld [vmem:[%s1659_s0 + $0x30] sm:$0xff] }
   0xc   :  { %v1204_v33 = vld [vmem:[%s1659_s0 + $0x70] sm:$0xff]  ;;  %v1197_v36 = vld [vmem:[%s1659_s0 + $0x38] sm:$0xff]  ;;  %v1399_v40 = vld [vmem:[%s1658_s2] ss:$0 sm:$0xff] }
   0xd   :  { %v1212_v34 = vld [vmem:[%s1659_s0 + $0xb0] sm:$0xff]  ;;  %v1205_v37 = vld [vmem:[%s1659_s0 + $0x78] sm:$0xff] }
   0xe   :  { %469 = vmatpush.bf16.msra.mxu0 %v1226_v3  ;;  %1239 = vmatpush.bf16.msra.mxu1 %v1226_v3  ;;  %v1220_v35 = vld [vmem:[%s1659_s0 + $0xf0] sm:$0xff]  ;;  %v1213_v38 = vld [vmem:[%s1659_s0 + $0xb8] sm:$0xff] }
   0xf   :  { %1240 = vmatpush.bf16.msra.mxu2 %v1226_v3  ;;  %1241 = vmatpush.bf16.msra.mxu3 %v1226_v3  ;;  %v1221_v39 = vld [vmem:[%s1659_s0 + $0xf8] sm:$0xff] }
  0x12   :  { %470 = vmatpush.bf16.msra.mxu0 %v1225_v4  ;;  %1242 = vmatpush.bf16.msra.mxu1 %v1225_v4 }
  0x13   :  { %1243 = vmatpush.bf16.msra.mxu2 %v1225_v4  ;;  %1244 = vmatpush.bf16.msra.mxu3 %v1225_v4 }
  0x16   :  { %471 = vmatpush.bf16.msra.mxu0 %v1224_v5  ;;  %1245 = vmatpush.bf16.msra.mxu1 %v1224_v5 }
  0x17   :  { %1246 = vmatpush.bf16.msra.mxu2 %v1224_v5  ;;  %1247 = vmatpush.bf16.msra.mxu3 %v1224_v5 }
  0x1a   :  { %472 = vmatpush.bf16.msra.mxu0 %v1223_v6  ;;  %1248 = vmatpush.bf16.msra.mxu1 %v1223_v6 }
  0x1b   :  { %1249 = vmatpush.bf16.msra.mxu2 %v1223_v6  ;;  %1250 = vmatpush.bf16.msra.mxu3 %v1223_v6 }
  0x1e   :  { %473 = vmatpush.bf16.msra.mxu0 %v1222_v7  ;;  %1251 = vmatpush.bf16.msra.mxu1 %v1222_v7 }
  0x1f   :  { %1252 = vmatpush.bf16.msra.mxu2 %v1222_v7  ;;  %1253 = vmatpush.bf16.msra.mxu3 %v1222_v7 }
  0x21   :  { %474 = vmatmul.bf16.vlgmr.msra.gmra.mxu0 %v1190_v8  ;;  %514 = vmatmul.bf16.vlgmr.msra.gmra.mxu1 %v1198_v9 }
  0x22   :  { %554 = vmatmul.bf16.vlgmr.msra.gmra.mxu2 %v1206_v10  ;;  %594 = vmatmul.bf16.vlgmr.msra.gmra.mxu3 %v1214_v11 }
  0x31   :  { %479 = vmatmul.bf16.gmra.mxu0 %v1191_v12  ;;  %519 = vmatmul.bf16.gmra.mxu1 %v1199_v13 }
  0x32   :  { %559 = vmatmul.bf16.gmra.mxu2 %v1207_v14  ;;  %599 = vmatmul.bf16.gmra.mxu3 %v1215_v15 }
  0x41   :  { %484 = vmatmul.bf16.gmra.mxu0 %v1192_v16  ;;  %524 = vmatmul.bf16.gmra.mxu1 %v1200_v17 }
  0x42   :  { %564 = vmatmul.bf16.gmra.mxu2 %v1208_v18  ;;  %604 = vmatmul.bf16.gmra.mxu3 %v1216_v19 }
  0x51   :  { %489 = vmatmul.bf16.gmra.mxu0 %v1193_v20  ;;  %529 = vmatmul.bf16.gmra.mxu1 %v1201_v21 }
  0x52   :  { %569 = vmatmul.bf16.gmra.mxu2 %v1209_v22  ;;  %609 = vmatmul.bf16.gmra.mxu3 %v1217_v23 }
  0x61   :  { %494 = vmatmul.bf16.gmra.mxu0 %v1194_v24  ;;  %534 = vmatmul.bf16.gmra.mxu1 %v1202_v25 }
  0x62   :  { %574 = vmatmul.bf16.gmra.mxu2 %v1210_v26  ;;  %614 = vmatmul.bf16.gmra.mxu3 %v1218_v27 }
  0x71   :  { %499 = vmatmul.bf16.gmra.mxu0 %v1195_v28  ;;  %539 = vmatmul.bf16.gmra.mxu1 %v1203_v29 }
  0x72   :  { %579 = vmatmul.bf16.gmra.mxu2 %v1211_v30  ;;  %619 = vmatmul.bf16.gmra.mxu3 %v1219_v31 }
  0x81   :  { %504 = vmatmul.bf16.gmra.mxu0 %v1196_v32  ;;  %544 = vmatmul.bf16.gmra.mxu1 %v1204_v33 }
  0x82   :  { %584 = vmatmul.bf16.gmra.mxu2 %v1212_v34  ;;  %624 = vmatmul.bf16.gmra.mxu3 %v1220_v35 }
  0x91   :  { %509 = vmatmul.bf16.gmra.mxu0 %v1197_v36  ;;  %549 = vmatmul.bf16.gmra.mxu1 %v1205_v37 }
  0x92   :  { %589 = vmatmul.bf16.gmra.mxu2 %v1213_v38  ;;  %629 = vmatmul.bf16.gmra.mxu3 %v1221_v39 }
  0x9e   :  { %v475_v41 = vpop.f32.mrf.mxu0  ;;  %v515_v42 = vpop.f32.mrf.mxu1 }
  0x9f   :  { %v834_v43 = vadd.f32 %v1399_v40, %v475_v41  ;;  %v850_v44 = vadd.f32 %v1399_v40, %v515_v42 }
  0xa1   :  { %v898_v45 = vmax.f32 %v834_v43, 0.0  ;;  %v914_v46 = vmax.f32 %v850_v44, 0.0 }
  0xa3   :  { %962 = vst [vmem:[%s1660_s3] sm:$0xff] %v898_v45 }
  0xa4   :  { %978 = vst [vmem:[%s1660_s3 + $0x80] sm:$0xff] %v914_v46 }
  0xa5   :  { %v555_v47 = vpop.f32.mrf.mxu2  ;;  %v595_v48 = vpop.f32.mrf.mxu3 }
  0xa6   :  { %v477_v49 = vpop.f32.mrf.mxu0  ;;  %v517_v50 = vpop.f32.mrf.mxu1  ;;  %v866_v51 = vadd.f32 %v1399_v40, %v555_v47  ;;  %v882_v52 = vadd.f32 %v1399_v40, %v595_v48 }
  0xa7   :  { %v835_v53 = vadd.f32 %v1399_v40, %v477_v49  ;;  %v851_v54 = vadd.f32 %v1399_v40, %v517_v50 }
  0xa8   :  { %v930_v55 = vmax.f32 %v866_v51, 0.0  ;;  %v946_v56 = vmax.f32 %v882_v52, 0.0 }
  0xa9   :  { %v899_v57 = vmax.f32 %v835_v53, 0.0  ;;  %v915_v58 = vmax.f32 %v851_v54, 0.0 }
  0xaa   :  { %994 = vst [vmem:[%s1660_s3 + $0x100] sm:$0xff] %v930_v55 }
  0xab   :  { %1010 = vst [vmem:[%s1660_s3 + $0x180] sm:$0xff] %v946_v56 }
  0xac   :  { %963 = vst [vmem:[%s1660_s3 + $0x8] sm:$0xff] %v899_v57 }
  0xad   :  { %v557_v59 = vpop.f32.mrf.mxu2  ;;  %v597_v60 = vpop.f32.mrf.mxu3  ;;  %979 = vst [vmem:[%s1660_s3 + $0x88] sm:$0xff] %v915_v58 }
  0xae   :  { %v480_v61 = vpop.f32.mrf.mxu0  ;;  %v520_v62 = vpop.f32.mrf.mxu1  ;;  %v867_v63 = vadd.f32 %v1399_v40, %v557_v59  ;;  %v883_v0 = vadd.f32 %v1399_v40, %v597_v60 }
  0xaf   :  { %v836_v1 = vadd.f32 %v1399_v40, %v480_v61  ;;  %v852_v2 = vadd.f32 %v1399_v40, %v520_v62 }
  0xb0   :  { %v931_v3 = vmax.f32 %v867_v63, 0.0  ;;  %v947_v4 = vmax.f32 %v883_v0, 0.0 }
  0xb1   :  { %v900_v5 = vmax.f32 %v836_v1, 0.0  ;;  %v916_v6 = vmax.f32 %v852_v2, 0.0 }
  0xb2   :  { %995 = vst [vmem:[%s1660_s3 + $0x108] sm:$0xff] %v931_v3 }
  0xb3   :  { %1011 = vst [vmem:[%s1660_s3 + $0x188] sm:$0xff] %v947_v4 }
  0xb4   :  { %964 = vst [vmem:[%s1660_s3 + $0x10] sm:$0xff] %v900_v5 }
  0xb5   :  { %v560_v7 = vpop.f32.mrf.mxu2  ;;  %v600_v8 = vpop.f32.mrf.mxu3  ;;  %980 = vst [vmem:[%s1660_s3 + $0x90] sm:$0xff] %v916_v6 }
  0xb6   :  { %v482_v9 = vpop.f32.mrf.mxu0  ;;  %v522_v10 = vpop.f32.mrf.mxu1  ;;  %v868_v11 = vadd.f32 %v1399_v40, %v560_v7  ;;  %v884_v12 = vadd.f32 %v1399_v40, %v600_v8 }
  0xb7   :  { %v837_v13 = vadd.f32 %v1399_v40, %v482_v9  ;;  %v853_v14 = vadd.f32 %v1399_v40, %v522_v10 }
  0xb8   :  { %v932_v15 = vmax.f32 %v868_v11, 0.0  ;;  %v948_v16 = vmax.f32 %v884_v12, 0.0 }
  0xb9   :  { %v901_v17 = vmax.f32 %v837_v13, 0.0  ;;  %v917_v18 = vmax.f32 %v853_v14, 0.0 }
  0xba   :  { %996 = vst [vmem:[%s1660_s3 + $0x110] sm:$0xff] %v932_v15 }
  0xbb   :  { %1012 = vst [vmem:[%s1660_s3 + $0x190] sm:$0xff] %v948_v16 }
  0xbc   :  { %965 = vst [vmem:[%s1660_s3 + $0x18] sm:$0xff] %v901_v17 }
  0xbd   :  { %v562_v19 = vpop.f32.mrf.mxu2  ;;  %v602_v20 = vpop.f32.mrf.mxu3  ;;  %981 = vst [vmem:[%s1660_s3 + $0x98] sm:$0xff] %v917_v18 }
  0xbe   :  { %v485_v21 = vpop.f32.mrf.mxu0  ;;  %v525_v22 = vpop.f32.mrf.mxu1  ;;  %v869_v23 = vadd.f32 %v1399_v40, %v562_v19  ;;  %v885_v24 = vadd.f32 %v1399_v40, %v602_v20 }
  0xbf   :  { %v838_v25 = vadd.f32 %v1399_v40, %v485_v21  ;;  %v854_v26 = vadd.f32 %v1399_v40, %v525_v22 }
  0xc0   :  { %v933_v27 = vmax.f32 %v869_v23, 0.0  ;;  %v949_v28 = vmax.f32 %v885_v24, 0.0 }
  0xc1   :  { %v902_v29 = vmax.f32 %v838_v25, 0.0  ;;  %v918_v30 = vmax.f32 %v854_v26, 0.0 }
  0xc2   :  { %997 = vst [vmem:[%s1660_s3 + $0x118] sm:$0xff] %v933_v27 }
  0xc3   :  { %1013 = vst [vmem:[%s1660_s3 + $0x198] sm:$0xff] %v949_v28 }
  0xc4   :  { %966 = vst [vmem:[%s1660_s3 + $0x20] sm:$0xff] %v902_v29 }
  0xc5   :  { %v565_v31 = vpop.f32.mrf.mxu2  ;;  %v605_v32 = vpop.f32.mrf.mxu3  ;;  %982 = vst [vmem:[%s1660_s3 + $0xa0] sm:$0xff] %v918_v30 }
  0xc6   :  { %v487_v33 = vpop.f32.mrf.mxu0  ;;  %v527_v34 = vpop.f32.mrf.mxu1  ;;  %v870_v35 = vadd.f32 %v1399_v40, %v565_v31  ;;  %v886_v36 = vadd.f32 %v1399_v40, %v605_v32 }
  0xc7   :  { %v839_v37 = vadd.f32 %v1399_v40, %v487_v33  ;;  %v855_v38 = vadd.f32 %v1399_v40, %v527_v34 }
  0xc8   :  { %v934_v39 = vmax.f32 %v870_v35, 0.0  ;;  %v950_v41 = vmax.f32 %v886_v36, 0.0 }
  0xc9   :  { %v903_v42 = vmax.f32 %v839_v37, 0.0  ;;  %v919_v43 = vmax.f32 %v855_v38, 0.0 }
  0xca   :  { %998 = vst [vmem:[%s1660_s3 + $0x120] sm:$0xff] %v934_v39 }
  0xcb   :  { %1014 = vst [vmem:[%s1660_s3 + $0x1a0] sm:$0xff] %v950_v41 }
  0xcc   :  { %967 = vst [vmem:[%s1660_s3 + $0x28] sm:$0xff] %v903_v42 }
  0xcd   :  { %v567_v44 = vpop.f32.mrf.mxu2  ;;  %v607_v45 = vpop.f32.mrf.mxu3  ;;  %983 = vst [vmem:[%s1660_s3 + $0xa8] sm:$0xff] %v919_v43 }
  0xce   :  { %v490_v46 = vpop.f32.mrf.mxu0  ;;  %v530_v47 = vpop.f32.mrf.mxu1  ;;  %v871_v48 = vadd.f32 %v1399_v40, %v567_v44  ;;  %v887_v49 = vadd.f32 %v1399_v40, %v607_v45 }
  0xcf   :  { %v840_v50 = vadd.f32 %v1399_v40, %v490_v46  ;;  %v856_v51 = vadd.f32 %v1399_v40, %v530_v47 }
  0xd0   :  { %v935_v52 = vmax.f32 %v871_v48, 0.0  ;;  %v951_v53 = vmax.f32 %v887_v49, 0.0 }
  0xd1   :  { %v904_v54 = vmax.f32 %v840_v50, 0.0  ;;  %v920_v55 = vmax.f32 %v856_v51, 0.0 }
  0xd2   :  { %999 = vst [vmem:[%s1660_s3 + $0x128] sm:$0xff] %v935_v52 }
  0xd3   :  { %1015 = vst [vmem:[%s1660_s3 + $0x1a8] sm:$0xff] %v951_v53 }
  0xd4   :  { %968 = vst [vmem:[%s1660_s3 + $0x30] sm:$0xff] %v904_v54 }
  0xd5   :  { %v570_v56 = vpop.f32.mrf.mxu2  ;;  %v610_v57 = vpop.f32.mrf.mxu3  ;;  %984 = vst [vmem:[%s1660_s3 + $0xb0] sm:$0xff] %v920_v55 }
  0xd6   :  { %v492_v58 = vpop.f32.mrf.mxu0  ;;  %v532_v59 = vpop.f32.mrf.mxu1  ;;  %v872_v60 = vadd.f32 %v1399_v40, %v570_v56  ;;  %v888_v61 = vadd.f32 %v1399_v40, %v610_v57 }
  0xd7   :  { %v841_v62 = vadd.f32 %v1399_v40, %v492_v58  ;;  %v857_v63 = vadd.f32 %v1399_v40, %v532_v59 }
  0xd8   :  { %v936_v0 = vmax.f32 %v872_v60, 0.0  ;;  %v952_v1 = vmax.f32 %v888_v61, 0.0 }
  0xd9   :  { %v905_v2 = vmax.f32 %v841_v62, 0.0  ;;  %v921_v3 = vmax.f32 %v857_v63, 0.0 }
  0xda   :  { %1000 = vst [vmem:[%s1660_s3 + $0x130] sm:$0xff] %v936_v0 }
  0xdb   :  { %1016 = vst [vmem:[%s1660_s3 + $0x1b0] sm:$0xff] %v952_v1 }
  0xdc   :  { %969 = vst [vmem:[%s1660_s3 + $0x38] sm:$0xff] %v905_v2 }
  0xdd   :  { %v572_v4 = vpop.f32.mrf.mxu2  ;;  %v612_v5 = vpop.f32.mrf.mxu3  ;;  %985 = vst [vmem:[%s1660_s3 + $0xb8] sm:$0xff] %v921_v3 }
  0xde   :  { %v495_v6 = vpop.f32.mrf.mxu0  ;;  %v535_v7 = vpop.f32.mrf.mxu1  ;;  %v873_v8 = vadd.f32 %v1399_v40, %v572_v4  ;;  %v889_v9 = vadd.f32 %v1399_v40, %v612_v5 }
  0xdf   :  { %v842_v10 = vadd.f32 %v1399_v40, %v495_v6  ;;  %v858_v11 = vadd.f32 %v1399_v40, %v535_v7 }
  0xe0   :  { %v937_v12 = vmax.f32 %v873_v8, 0.0  ;;  %v953_v13 = vmax.f32 %v889_v9, 0.0 }
  0xe1   :  { %v906_v14 = vmax.f32 %v842_v10, 0.0  ;;  %v922_v15 = vmax.f32 %v858_v11, 0.0 }
  0xe2   :  { %1001 = vst [vmem:[%s1660_s3 + $0x138] sm:$0xff] %v937_v12 }
  0xe3   :  { %1017 = vst [vmem:[%s1660_s3 + $0x1b8] sm:$0xff] %v953_v13 }
  0xe4   :  { %970 = vst [vmem:[%s1660_s3 + $0x40] sm:$0xff] %v906_v14 }
  0xe5   :  { %v575_v16 = vpop.f32.mrf.mxu2  ;;  %v615_v17 = vpop.f32.mrf.mxu3  ;;  %986 = vst [vmem:[%s1660_s3 + $0xc0] sm:$0xff] %v922_v15 }
  0xe6   :  { %v497_v18 = vpop.f32.mrf.mxu0  ;;  %v537_v19 = vpop.f32.mrf.mxu1  ;;  %v874_v20 = vadd.f32 %v1399_v40, %v575_v16  ;;  %v890_v21 = vadd.f32 %v1399_v40, %v615_v17 }
  0xe7   :  { %v843_v22 = vadd.f32 %v1399_v40, %v497_v18  ;;  %v859_v23 = vadd.f32 %v1399_v40, %v537_v19 }
  0xe8   :  { %v938_v24 = vmax.f32 %v874_v20, 0.0  ;;  %v954_v25 = vmax.f32 %v890_v21, 0.0 }
  0xe9   :  { %v907_v26 = vmax.f32 %v843_v22, 0.0  ;;  %v923_v27 = vmax.f32 %v859_v23, 0.0 }
  0xea   :  { %1002 = vst [vmem:[%s1660_s3 + $0x140] sm:$0xff] %v938_v24 }
  0xeb   :  { %1018 = vst [vmem:[%s1660_s3 + $0x1c0] sm:$0xff] %v954_v25 }
  0xec   :  { %971 = vst [vmem:[%s1660_s3 + $0x48] sm:$0xff] %v907_v26 }
  0xed   :  { %v577_v28 = vpop.f32.mrf.mxu2  ;;  %v617_v29 = vpop.f32.mrf.mxu3  ;;  %987 = vst [vmem:[%s1660_s3 + $0xc8] sm:$0xff] %v923_v27 }
  0xee   :  { %v500_v30 = vpop.f32.mrf.mxu0  ;;  %v540_v31 = vpop.f32.mrf.mxu1  ;;  %v875_v32 = vadd.f32 %v1399_v40, %v577_v28  ;;  %v891_v33 = vadd.f32 %v1399_v40, %v617_v29 }
  0xef   :  { %v844_v34 = vadd.f32 %v1399_v40, %v500_v30  ;;  %v860_v35 = vadd.f32 %v1399_v40, %v540_v31 }
  0xf0   :  { %v939_v36 = vmax.f32 %v875_v32, 0.0  ;;  %v955_v37 = vmax.f32 %v891_v33, 0.0 }
  0xf1   :  { %v908_v38 = vmax.f32 %v844_v34, 0.0  ;;  %v924_v39 = vmax.f32 %v860_v35, 0.0 }
  0xf2   :  { %1003 = vst [vmem:[%s1660_s3 + $0x148] sm:$0xff] %v939_v36 }
  0xf3   :  { %1019 = vst [vmem:[%s1660_s3 + $0x1c8] sm:$0xff] %v955_v37 }
  0xf4   :  { %972 = vst [vmem:[%s1660_s3 + $0x50] sm:$0xff] %v908_v38 }
  0xf5   :  { %v580_v41 = vpop.f32.mrf.mxu2  ;;  %v620_v42 = vpop.f32.mrf.mxu3  ;;  %988 = vst [vmem:[%s1660_s3 + $0xd0] sm:$0xff] %v924_v39 }
  0xf6   :  { %v502_v43 = vpop.f32.mrf.mxu0  ;;  %v542_v44 = vpop.f32.mrf.mxu1  ;;  %v876_v45 = vadd.f32 %v1399_v40, %v580_v41  ;;  %v892_v46 = vadd.f32 %v1399_v40, %v620_v42 }
  0xf7   :  { %v845_v47 = vadd.f32 %v1399_v40, %v502_v43  ;;  %v861_v48 = vadd.f32 %v1399_v40, %v542_v44 }
  0xf8   :  { %v940_v49 = vmax.f32 %v876_v45, 0.0  ;;  %v956_v50 = vmax.f32 %v892_v46, 0.0 }
  0xf9   :  { %v909_v51 = vmax.f32 %v845_v47, 0.0  ;;  %v925_v52 = vmax.f32 %v861_v48, 0.0 }
  0xfa   :  { %1004 = vst [vmem:[%s1660_s3 + $0x150] sm:$0xff] %v940_v49 }
  0xfb   :  { %1020 = vst [vmem:[%s1660_s3 + $0x1d0] sm:$0xff] %v956_v50 }
  0xfc   :  { %973 = vst [vmem:[%s1660_s3 + $0x58] sm:$0xff] %v909_v51 }
  0xfd   :  { %v582_v53 = vpop.f32.mrf.mxu2  ;;  %v622_v54 = vpop.f32.mrf.mxu3  ;;  %989 = vst [vmem:[%s1660_s3 + $0xd8] sm:$0xff] %v925_v52 }
  0xfe   :  { %v505_v55 = vpop.f32.mrf.mxu0  ;;  %v545_v56 = vpop.f32.mrf.mxu1  ;;  %v877_v57 = vadd.f32 %v1399_v40, %v582_v53  ;;  %v893_v58 = vadd.f32 %v1399_v40, %v622_v54 }
  0xff   :  { %v846_v59 = vadd.f32 %v1399_v40, %v505_v55  ;;  %v862_v60 = vadd.f32 %v1399_v40, %v545_v56 }
 0x100   :  { %v941_v61 = vmax.f32 %v877_v57, 0.0  ;;  %v957_v62 = vmax.f32 %v893_v58, 0.0 }
 0x101   :  { %v910_v63 = vmax.f32 %v846_v59, 0.0  ;;  %v926_v0 = vmax.f32 %v862_v60, 0.0 }
 0x102   :  { %1005 = vst [vmem:[%s1660_s3 + $0x158] sm:$0xff] %v941_v61 }
 0x103   :  { %1021 = vst [vmem:[%s1660_s3 + $0x1d8] sm:$0xff] %v957_v62 }
 0x104   :  { %974 = vst [vmem:[%s1660_s3 + $0x60] sm:$0xff] %v910_v63 }
 0x105   :  { %v585_v1 = vpop.f32.mrf.mxu2  ;;  %v625_v2 = vpop.f32.mrf.mxu3  ;;  %990 = vst [vmem:[%s1660_s3 + $0xe0] sm:$0xff] %v926_v0 }
 0x106   :  { %v507_v3 = vpop.f32.mrf.mxu0  ;;  %v547_v4 = vpop.f32.mrf.mxu1  ;;  %v878_v5 = vadd.f32 %v1399_v40, %v585_v1  ;;  %v894_v6 = vadd.f32 %v1399_v40, %v625_v2 }
 0x107   :  { %v847_v7 = vadd.f32 %v1399_v40, %v507_v3  ;;  %v863_v8 = vadd.f32 %v1399_v40, %v547_v4 }
 0x108   :  { %v942_v9 = vmax.f32 %v878_v5, 0.0  ;;  %v958_v10 = vmax.f32 %v894_v6, 0.0 }
 0x109   :  { %v911_v11 = vmax.f32 %v847_v7, 0.0  ;;  %v927_v12 = vmax.f32 %v863_v8, 0.0 }
 0x10a   :  { %1006 = vst [vmem:[%s1660_s3 + $0x160] sm:$0xff] %v942_v9 }
 0x10b   :  { %1022 = vst [vmem:[%s1660_s3 + $0x1e0] sm:$0xff] %v958_v10 }
 0x10c   :  { %975 = vst [vmem:[%s1660_s3 + $0x68] sm:$0xff] %v911_v11 }
 0x10d   :  { %v587_v13 = vpop.f32.mrf.mxu2  ;;  %v627_v14 = vpop.f32.mrf.mxu3  ;;  %991 = vst [vmem:[%s1660_s3 + $0xe8] sm:$0xff] %v927_v12 }
 0x10e   :  { %v510_v15 = vpop.f32.mrf.mxu0  ;;  %v550_v16 = vpop.f32.mrf.mxu1  ;;  %v879_v17 = vadd.f32 %v1399_v40, %v587_v13  ;;  %v895_v18 = vadd.f32 %v1399_v40, %v627_v14 }
 0x10f   :  { %v848_v19 = vadd.f32 %v1399_v40, %v510_v15  ;;  %v864_v20 = vadd.f32 %v1399_v40, %v550_v16 }
 0x110   :  { %v943_v21 = vmax.f32 %v879_v17, 0.0  ;;  %v959_v22 = vmax.f32 %v895_v18, 0.0 }
 0x111   :  { %v912_v23 = vmax.f32 %v848_v19, 0.0  ;;  %v928_v24 = vmax.f32 %v864_v20, 0.0 }
 0x112   :  { %1007 = vst [vmem:[%s1660_s3 + $0x168] sm:$0xff] %v943_v21 }
 0x113   :  { %1023 = vst [vmem:[%s1660_s3 + $0x1e8] sm:$0xff] %v959_v22 }
 0x114   :  { %976 = vst [vmem:[%s1660_s3 + $0x70] sm:$0xff] %v912_v23 }
 0x115   :  { %v590_v25 = vpop.f32.mrf.mxu2  ;;  %v630_v26 = vpop.f32.mrf.mxu3  ;;  %992 = vst [vmem:[%s1660_s3 + $0xf0] sm:$0xff] %v928_v24 }
 0x116   :  { %v512_v27 = vpop.f32.mrf.mxu0  ;;  %v552_v28 = vpop.f32.mrf.mxu1  ;;  %v880_v29 = vadd.f32 %v1399_v40, %v590_v25  ;;  %v896_v30 = vadd.f32 %v1399_v40, %v630_v26 }
 0x117   :  { %v849_v31 = vadd.f32 %v1399_v40, %v512_v27  ;;  %v865_v32 = vadd.f32 %v1399_v40, %v552_v28 }
 0x118   :  { %v944_v33 = vmax.f32 %v880_v29, 0.0  ;;  %v960_v34 = vmax.f32 %v896_v30, 0.0 }
 0x119   :  { %v913_v35 = vmax.f32 %v849_v31, 0.0  ;;  %v929_v36 = vmax.f32 %v865_v32, 0.0 }
 0x11a   :  { %1008 = vst [vmem:[%s1660_s3 + $0x170] sm:$0xff] %v944_v33 }
 0x11b   :  { %1024 = vst [vmem:[%s1660_s3 + $0x1f0] sm:$0xff] %v960_v34 }
 0x11c   :  { %977 = vst [vmem:[%s1660_s3 + $0x78] sm:$0xff] %v913_v35 }
 0x11d   :  { %v592_v37 = vpop.f32.mrf.mxu2  ;;  %v632_v38 = vpop.f32.mrf.mxu3  ;;  %993 = vst [vmem:[%s1660_s3 + $0xf8] sm:$0xff] %v929_v36 }
 0x11e   :  { %v881_v39 = vadd.f32 %v1399_v40, %v592_v37  ;;  %v897_v41 = vadd.f32 %v1399_v40, %v632_v38 }
 0x120   :  { %v945_v42 = vmax.f32 %v881_v39, 0.0  ;;  %v961_v43 = vmax.f32 %v897_v41, 0.0 }
 0x122   :  { %1009 = vst [vmem:[%s1660_s3 + $0x178] sm:$0xff] %v945_v42 }
 0x123   :  { %1025 = vst [vmem:[%s1660_s3 + $0x1f8] sm:$0xff] %v961_v43 }

</bundles_post_ra>
